<compile_context>
chip_gen: v7x
topology: tpu7x:2x2x1
jax: 0.10.0
libtpu: 0.0.40
codegen_flags: <defaults>
</compile_context>

<pallas_src>
import functools

import jax
import jax.numpy as jnp
from jax.experimental import pallas as pl
from jax.experimental.pallas import tpu as pltpu


def _silu(x):
    return x * jax.nn.sigmoid(x)


def repn_bottleneck_kernel(x_ref, a_ref, b1_ref, bm_ref, b2_ref, out_ref, *,
                           add, img_h):
    # x_ref  : (B_tile*H, W*C1)   lane-dense, unshifted image rows
    # a_ref  : (3, W*C1, W*C_)    cv1 banded weights per dy (1x1 branch + BN folded)
    # b1_ref : (1, W*C_)          cv1 bias tiled over W
    # bm_ref : (3, W*C_, W*C2)    cv2 banded weights per dy (BN folded)
    # b2_ref : (1, W*C2)          cv2 bias tiled over W
    # out_ref: (B_tile*H, W*C2)
    rows = x_ref.shape[0]
    x = x_ref[...]

    def conv3x3(lhs, w_ref, bias_row):
        width = w_ref.shape[2]
        # Per-image H-boundary masks: the sublane roll wraps across image /
        # batch-tile boundaries; those target rows must get the zero padding.
        r = jax.lax.broadcasted_iota(jnp.int32, (rows, width), 0) % img_h
        not_first_row = r != 0                 # target rows of the dy=0 tap
        not_last_row = r != (img_h - 1)        # target rows of the dy=2 tap

        # Partial products against UNSHIFTED rows; the dy shift is applied to
        # the outputs with a sublane rotate (XLU) + boundary mask, so the
        # input is never re-materialized per tap and no scratch is needed.
        q0 = jnp.dot(lhs, w_ref[0], preferred_element_type=jnp.float32)
        q1 = jnp.dot(lhs, w_ref[1], preferred_element_type=jnp.float32)
        q2 = jnp.dot(lhs, w_ref[2], preferred_element_type=jnp.float32)
        acc = q1
        acc = acc + jnp.where(not_first_row,
                              pltpu.roll(q0, shift=1, axis=0), 0.0)
        acc = acc + jnp.where(not_last_row,
                              pltpu.roll(q2, shift=rows - 1, axis=0), 0.0)
        return acc + bias_row

    # cv1: RepConvN (3x3 + 1x1, BN folded) -> SiLU.  y1 stays in vregs.
    y1 = _silu(conv3x3(x, a_ref, b1_ref[...]))
    # cv2: Conv 3x3 + BN (folded) -> SiLU.
    y2 = _silu(conv3x3(y1, bm_ref, b2_ref[...]))

    if add:
        y2 = y2 + x                  # residual: same unshifted rows (C1 == C2)
    out_ref[...] = y2.astype(out_ref.dtype)


def _banded_row_weights(w_hwio, W):
    """Fold dx taps + W zero padding of a 3x3 'same' conv into per-dy
    block-tridiagonal (W*Cin, W*Cout) matrices."""
    KH, KW, cin, cout = w_hwio.shape
    mats = []
    for dy in range(KH):
        a = jnp.zeros((W, cin, W, cout), w_hwio.dtype)
        for dx in range(KW):
            # S[w_in, w_out] = 1 iff w_in == w_out + dx - 1 (edges cropped -> zero pad)
            s = jnp.eye(W, k=1 - dx, dtype=w_hwio.dtype)
            a = a + jnp.einsum("io,cd->icod", s, w_hwio[dy, dx])
        mats.append(a.reshape(W * cin, W * cout))
    return jnp.stack(mats)                                   # (3, W*Cin, W*Cout)


def _pick_batch_tile(n, h, target_rows=256):
    """Largest divisor b of n with b*h <= target_rows, keeping >= 2 grid steps
    when n >= 2 so both v7x TensorCores get work (a single step would idle one
    core there; single-TC v5e/v6e only collapse the grid when n == 1)."""
    best = 1
    for b in range(1, n + 1):
        if n % b == 0 and b * h <= target_rows and (n // b >= 2 or n == 1):
            best = b
    return best


def repn_bottleneck(x_nhwc, w3_hwio, w1_io, b1, w2_hwio, b2, *, add):
    """x_nhwc: (N, H, W, C1) float32; conv weights have BN already folded in."""
    N, H, W, C1 = x_nhwc.shape
    C_ = w3_hwio.shape[3]
    C2 = w2_hwio.shape[3]

    # Fold the RepConvN 1x1 branch into the 3x3 center tap (exact fusion).
    w3f = w3_hwio.at[1, 1].add(w1_io)

    a_band = _banded_row_weights(w3f, W)                     # (3, W*C1, W*C_)
    b_band = _banded_row_weights(w2_hwio, W)                 # (3, W*C_, W*C2)
    b1row = jnp.tile(b1.reshape(-1), W).reshape(1, W * C_)
    b2row = jnp.tile(b2.reshape(-1), W).reshape(1, W * C2)

    # Banded weights scale as W^2 * Cin * Cout (~196 KB here).  For large W*C
    # the band should be W-tiled (or fall back to per-tap matmuls) before
    # reusing this kernel; guard loudly instead of OOMing VMEM.
    band_bytes = 4 * (a_band.size + b_band.size)
    assert band_bytes < 8 * 1024 * 1024, "banded weights too large; W-tile them"

    b_tile = _pick_batch_tile(N, H)
    grid_n = N // b_tile
    rows = b_tile * H
    assert rows % 8 == 0 or grid_n == 1, "block rows must be sublane aligned"

    # Trivial row-major reshapes: (N,H,W,C) <-> (N*H, W*C), no data movement.
    x_rows = x_nhwc.reshape(N * H, W * C1)

    kernel = functools.partial(repn_bottleneck_kernel, add=add, img_h=H)
    out_rows = pl.pallas_call(
        kernel,
        out_shape=jax.ShapeDtypeStruct((N * H, W * C2), x_nhwc.dtype),
        grid=(grid_n,),
        in_specs=[
            pl.BlockSpec((rows, W * C1), lambda n: (n, 0)),
            # Constant-index weight/bias blocks (index_map never changes).
            # TODO(synk): pipeline_mode=pl.Buffered(1) would single-buffer these
            # never-changing blocks; omitted to keep compilation conservative.
            pl.BlockSpec((3, W * C1, W * C_), lambda n: (0, 0, 0)),
            pl.BlockSpec((1, W * C_), lambda n: (0, 0)),
            pl.BlockSpec((3, W * C_, W * C2), lambda n: (0, 0, 0)),
            pl.BlockSpec((1, W * C2), lambda n: (0, 0)),
        ],
        out_specs=pl.BlockSpec((rows, W * C2), lambda n: (n, 0)),
        compiler_params=pltpu.CompilerParams(
            dimension_semantics=("parallel",)),
    )(x_rows, a_band, b1row, b_band, b2row)
    return out_rows.reshape(N, H, W, C2)


def fold_bn(w_oihw, gamma, beta, mean, var, eps=1e-5):
    """Fold eval-mode BatchNorm2d into a bias-free conv. Returns (w_oihw, bias)."""
    scale = gamma / jnp.sqrt(var + eps)
    w = w_oihw * scale[:, None, None, None]
    b = beta - mean * scale
    return w, b


def make_params(key, c1, c2, e=0.5):
    c_ = int(c2 * e)
    ks = jax.random.split(key, 12)

    def w(k, shape, fan_in):
        return jax.random.normal(k, shape, jnp.float32) * (1.0 / jnp.sqrt(fan_in))

    # RepConvN.conv1 : 3x3, c1 -> c_, BN
    w3 = w(ks[0], (c_, c1, 3, 3), c1 * 9)
    g3 = 1.0 + 0.1 * jax.random.normal(ks[1], (c_,), jnp.float32)
    b3 = 0.1 * jax.random.normal(ks[2], (c_,), jnp.float32)
    m3 = 0.1 * jax.random.normal(ks[3], (c_,), jnp.float32)
    v3 = jnp.abs(jax.random.normal(ks[4], (c_,), jnp.float32)) + 0.5
    # RepConvN.conv2 : 1x1, c1 -> c_, BN
    w1 = w(ks[5], (c_, c1, 1, 1), c1)
    g1 = 1.0 + 0.1 * jax.random.normal(ks[6], (c_,), jnp.float32)
    b1 = 0.1 * jax.random.normal(ks[7], (c_,), jnp.float32)
    m1 = 0.1 * jax.random.normal(ks[8], (c_,), jnp.float32)
    v1 = jnp.abs(jax.random.normal(ks[9], (c_,), jnp.float32)) + 0.5
    # cv2 : 3x3, c_ -> c2, BN
    w2 = w(ks[10], (c2, c_, 3, 3), c_ * 9)
    g2 = 1.0 + 0.05 * jnp.arange(c2, dtype=jnp.float32) / c2
    b2 = 0.05 * jnp.ones((c2,), jnp.float32)
    m2 = jnp.zeros((c2,), jnp.float32)
    v2 = jnp.ones((c2,), jnp.float32)
    # TODO(synk): BatchNorm is folded with running statistics (eval-mode semantics);
    # training-mode batch statistics are not reproduced.

    w3f, bias3 = fold_bn(w3, g3, b3, m3, v3)
    w1f, bias1 = fold_bn(w1, g1, b1, m1, v1)
    w2f, bias2 = fold_bn(w2, g2, b2, m2, v2)

    # OIHW -> HWIO for the kernel.
    w3_hwio = jnp.transpose(w3f, (2, 3, 1, 0))               # (3,3,c1,c_)
    w1_io = jnp.transpose(w1f[:, :, 0, 0], (1, 0))           # (c1,c_)
    w2_hwio = jnp.transpose(w2f, (2, 3, 1, 0))               # (3,3,c_,c2)
    return w3_hwio, w1_io, (bias3 + bias1), w2_hwio, bias2


def reference_forward(x_nhwc, w3, w1, b1, w2, b2, *, add):
    dn = ("NHWC", "HWIO", "NHWC")
    c1 = x_nhwc.shape[-1]
    c_ = w3.shape[-1]
    conv = lambda x, w: jax.lax.conv_general_dilated(
        x, w, (1, 1), "SAME", dimension_numbers=dn)
    y = conv(x_nhwc, w3) + conv(x_nhwc, w1.reshape(1, 1, c1, c_)) + b1.reshape(1, 1, 1, -1)
    y = jax.nn.silu(y)
    z = conv(y, w2) + b2.reshape(1, 1, 1, -1)
    z = jax.nn.silu(z)
    return x_nhwc + z if add else z


if __name__ == "__main__":
    N, C1, C2, H, W = 2, 8, 8, 16, 16     # matches RepNBottleneck(c1=8, c2=8)
    shortcut, e = True, 0.5
    add = shortcut and (C1 == C2)

    key = jax.random.PRNGKey(0)
    kx, kp = jax.random.split(key)
    # PyTorch input would be NCHW (N, C1, H, W); the kernel works in NHWC.
    x_nchw = jax.random.normal(kx, (N, C1, H, W), jnp.float32)
    x_nhwc = jnp.transpose(x_nchw, (0, 2, 3, 1))

    w3, w1, b1, w2, b2 = make_params(kp, C1, C2, e)

    out = repn_bottleneck(x_nhwc, w3, w1, b1, w2, b2, add=add)
    out = jax.block_until_ready(out)

    ref = reference_forward(x_nhwc, w3, w1, b1, w2, b2, add=add)
    assert out.shape == (N, H, W, C2)
    err = float(jnp.max(jnp.abs(out - ref)))
    assert jnp.allclose(out, ref, atol=1e-3, rtol=1e-3), err

    print("KERNEL_OK")
</pallas_src>

<mosaic_0001>
module attributes {stable_mosaic.version = 11 : i64} {
  func.func @repn_bottleneck_kernel(%arg0: i32, %arg1: memref<16x128xf32, #tpu.memory_space<vmem>>, %arg2: memref<3x128x64xf32, #tpu.memory_space<vmem>>, %arg3: memref<1x64xf32, #tpu.memory_space<vmem>>, %arg4: memref<3x64x128xf32, #tpu.memory_space<vmem>>, %arg5: memref<1x128xf32, #tpu.memory_space<vmem>>, %arg6: memref<16x128xf32, #tpu.memory_space<vmem>>) attributes {dimension_semantics = [#tpu.dimension_semantics<parallel>], iteration_bounds = array<i64: 2>, scalar_prefetch = 0 : i64, scratch_operands = 0 : i64, tpu.core_type = #tpu.core_type<tc>, window_params = [{transform_indices = @transform_0, window_bounds = array<i64: 16, 128>}, {pipeline_mode = #tpu.pipeline_mode<synchronous>, transform_indices = @transform_1, window_bounds = array<i64: 3, 128, 64>}, {pipeline_mode = #tpu.pipeline_mode<synchronous>, transform_indices = @transform_2, window_bounds = array<i64: 1, 64>}, {pipeline_mode = #tpu.pipeline_mode<synchronous>, transform_indices = @transform_3, window_bounds = array<i64: 3, 64, 128>}, {pipeline_mode = #tpu.pipeline_mode<synchronous>, transform_indices = @transform_4, window_bounds = array<i64: 1, 128>}, {transform_indices = @transform_5, window_bounds = array<i64: 16, 128>}]} {
    %c0 = arith.constant 0 : index
    %c0_0 = arith.constant 0 : index
    %0 = vector.load %arg1[%c0, %c0_0] : memref<16x128xf32, #tpu.memory_space<vmem>>, vector<16x128xf32>
    %c0_1 = arith.constant 0 : index
    %c0_2 = arith.constant 0 : index
    %1 = vector.load %arg3[%c0_1, %c0_2] : memref<1x64xf32, #tpu.memory_space<vmem>>, vector<1x64xf32>
    %2 = tpu.iota {dimensions = array<i32: 0>} : vector<16x64xi32>
    %c16_i32 = arith.constant 16 : i32
    %c0_i32 = arith.constant 0 : i32
    %3 = arith.cmpi eq, %c16_i32, %c0_i32 : i32
    %c1_i32 = arith.constant 1 : i32
    %4 = arith.select %3, %c1_i32, %c16_i32 : i32
    %5 = vector.broadcast %4 : i32 to vector<16x64xi32>
    %6 = arith.remsi %2, %5 : vector<16x64xi32>
    %c0_i32_3 = arith.constant 0 : i32
    %7 = vector.broadcast %c0_i32_3 : i32 to vector<16x64xi32>
    %8 = arith.cmpi ne, %6, %7 : vector<16x64xi32>
    %c0_i32_4 = arith.constant 0 : i32
    %9 = vector.broadcast %c0_i32_4 : i32 to vector<16x64xi32>
    %10 = arith.cmpi slt, %6, %9 : vector<16x64xi32>
    %c0_i32_5 = arith.constant 0 : i32
    %11 = arith.cmpi slt, %4, %c0_i32_5 : i32
    %12 = vector.broadcast %11 : i1 to vector<16x64xi1>
    %13 = vector.broadcast %12 : vector<16x64xi1> to vector<16x64xi1>
    %14 = arith.xori %10, %13 : vector<16x64xi1>
    %15 = arith.andi %14, %8 : vector<16x64xi1>
    %16 = vector.broadcast %4 : i32 to vector<16x64xi32>
    %17 = arith.addi %6, %16 : vector<16x64xi32>
    %18 = arith.select %15, %17, %6 : vector<16x64xi1>, vector<16x64xi32>
    %c0_i32_6 = arith.constant 0 : i32
    %19 = vector.broadcast %c0_i32_6 : i32 to vector<16x64xi32>
    %20 = arith.cmpi ne, %18, %19 : vector<16x64xi32>
    %c15_i32 = arith.constant 15 : i32
    %21 = vector.broadcast %c15_i32 : i32 to vector<16x64xi32>
    %22 = arith.cmpi ne, %18, %21 : vector<16x64xi32>
    %c0_7 = arith.constant 0 : index
    %c0_8 = arith.constant 0 : index
    %c0_9 = arith.constant 0 : index
    %23 = vector.load %arg2[%c0_7, %c0_8, %c0_9] : memref<3x128x64xf32, #tpu.memory_space<vmem>>, vector<1x128x64xf32>
    %24 = vector.shape_cast %23 : vector<1x128x64xf32> to vector<128x64xf32>
    %cst = arith.constant dense<0.000000e+00> : vector<16x64xf32>
    %25 = tpu.matmul %0, %24, %cst {dimension_numbers = #tpu.dot_dimension_numbers<[1], [0], [0], [1], [0, 0, 1, 1], [], []>} : vector<16x128xf32>, vector<128x64xf32>, vector<16x64xf32> -> vector<16x64xf32>
    %c1 = arith.constant 1 : index
    %c0_10 = arith.constant 0 : index
    %c0_11 = arith.constant 0 : index
    %26 = vector.load %arg2[%c1, %c0_10, %c0_11] : memref<3x128x64xf32, #tpu.memory_space<vmem>>, vector<1x128x64xf32>
    %27 = vector.shape_cast %26 : vector<1x128x64xf32> to vector<128x64xf32>
    %cst_12 = arith.constant dense<0.000000e+00> : vector<16x64xf32>
    %28 = tpu.matmul %0, %27, %cst_12 {dimension_numbers = #tpu.dot_dimension_numbers<[1], [0], [0], [1], [0, 0, 1, 1], [], []>} : vector<16x128xf32>, vector<128x64xf32>, vector<16x64xf32> -> vector<16x64xf32>
    %c2 = arith.constant 2 : index
    %c0_13 = arith.constant 0 : index
    %c0_14 = arith.constant 0 : index
    %29 = vector.load %arg2[%c2, %c0_13, %c0_14] : memref<3x128x64xf32, #tpu.memory_space<vmem>>, vector<1x128x64xf32>
    %30 = vector.shape_cast %29 : vector<1x128x64xf32> to vector<128x64xf32>
    %cst_15 = arith.constant dense<0.000000e+00> : vector<16x64xf32>
    %31 = tpu.matmul %0, %30, %cst_15 {dimension_numbers = #tpu.dot_dimension_numbers<[1], [0], [0], [1], [0, 0, 1, 1], [], []>} : vector<16x128xf32>, vector<128x64xf32>, vector<16x64xf32> -> vector<16x64xf32>
    %c1_i32_16 = arith.constant 1 : i32
    %32 = tpu.dynamic_rotate %25 by %c1_i32_16 dim 0 : vector<16x64xf32>, i32 -> vector<16x64xf32>
    %cst_17 = arith.constant 0.000000e+00 : f32
    %33 = vector.broadcast %cst_17 : f32 to vector<16x64xf32>
    %34 = arith.select %20, %32, %33 : vector<16x64xi1>, vector<16x64xf32>
    %35 = arith.addf %28, %34 : vector<16x64xf32>
    %c15_i32_18 = arith.constant 15 : i32
    %36 = tpu.dynamic_rotate %31 by %c15_i32_18 dim 0 : vector<16x64xf32>, i32 -> vector<16x64xf32>
    %cst_19 = arith.constant 0.000000e+00 : f32
    %37 = vector.broadcast %cst_19 : f32 to vector<16x64xf32>
    %38 = arith.select %22, %36, %37 : vector<16x64xi1>, vector<16x64xf32>
    %39 = arith.addf %35, %38 : vector<16x64xf32>
    %40 = vector.broadcast %1 : vector<1x64xf32> to vector<16x64xf32>
    %41 = arith.addf %39, %40 : vector<16x64xf32>
    %42 = arith.negf %41 : vector<16x64xf32>
    %43 = math.exp %42 : vector<16x64xf32>
    %cst_20 = arith.constant 1.000000e+00 : f32
    %44 = vector.broadcast %cst_20 : f32 to vector<16x64xf32>
    %45 = arith.addf %44, %43 : vector<16x64xf32>
    %46 = arith.divf %44, %45 : vector<16x64xf32>
    %47 = arith.mulf %41, %46 : vector<16x64xf32>
    %c0_21 = arith.constant 0 : index
    %c0_22 = arith.constant 0 : index
    %48 = vector.load %arg5[%c0_21, %c0_22] : memref<1x128xf32, #tpu.memory_space<vmem>>, vector<1x128xf32>
    %49 = tpu.iota {dimensions = array<i32: 0>} : vector<16x128xi32>
    %c16_i32_23 = arith.constant 16 : i32
    %c0_i32_24 = arith.constant 0 : i32
    %50 = arith.cmpi eq, %c16_i32_23, %c0_i32_24 : i32
    %c1_i32_25 = arith.constant 1 : i32
    %51 = arith.select %50, %c1_i32_25, %c16_i32_23 : i32
    %52 = vector.broadcast %51 : i32 to vector<16x128xi32>
    %53 = arith.remsi %49, %52 : vector<16x128xi32>
    %c0_i32_26 = arith.constant 0 : i32
    %54 = vector.broadcast %c0_i32_26 : i32 to vector<16x128xi32>
    %55 = arith.cmpi ne, %53, %54 : vector<16x128xi32>
    %c0_i32_27 = arith.constant 0 : i32
    %56 = vector.broadcast %c0_i32_27 : i32 to vector<16x128xi32>
    %57 = arith.cmpi slt, %53, %56 : vector<16x128xi32>
    %c0_i32_28 = arith.constant 0 : i32
    %58 = arith.cmpi slt, %51, %c0_i32_28 : i32
    %59 = vector.broadcast %58 : i1 to vector<16x128xi1>
    %60 = vector.broadcast %59 : vector<16x128xi1> to vector<16x128xi1>
    %61 = arith.xori %57, %60 : vector<16x128xi1>
    %62 = arith.andi %61, %55 : vector<16x128xi1>
    %63 = vector.broadcast %51 : i32 to vector<16x128xi32>
    %64 = arith.addi %53, %63 : vector<16x128xi32>
    %65 = arith.select %62, %64, %53 : vector<16x128xi1>, vector<16x128xi32>
    %c0_i32_29 = arith.constant 0 : i32
    %66 = vector.broadcast %c0_i32_29 : i32 to vector<16x128xi32>
    %67 = arith.cmpi ne, %65, %66 : vector<16x128xi32>
    %c15_i32_30 = arith.constant 15 : i32
    %68 = vector.broadcast %c15_i32_30 : i32 to vector<16x128xi32>
    %69 = arith.cmpi ne, %65, %68 : vector<16x128xi32>
    %c0_31 = arith.constant 0 : index
    %c0_32 = arith.constant 0 : index
    %c0_33 = arith.constant 0 : index
    %70 = vector.load %arg4[%c0_31, %c0_32, %c0_33] : memref<3x64x128xf32, #tpu.memory_space<vmem>>, vector<1x64x128xf32>
    %71 = vector.shape_cast %70 : vector<1x64x128xf32> to vector<64x128xf32>
    %cst_34 = arith.constant dense<0.000000e+00> : vector<16x128xf32>
    %72 = tpu.matmul %47, %71, %cst_34 {dimension_numbers = #tpu.dot_dimension_numbers<[1], [0], [0], [1], [0, 0, 1, 1], [], []>} : vector<16x64xf32>, vector<64x128xf32>, vector<16x128xf32> -> vector<16x128xf32>
    %c1_35 = arith.constant 1 : index
    %c0_36 = arith.constant 0 : index
    %c0_37 = arith.constant 0 : index
    %73 = vector.load %arg4[%c1_35, %c0_36, %c0_37] : memref<3x64x128xf32, #tpu.memory_space<vmem>>, vector<1x64x128xf32>
    %74 = vector.shape_cast %73 : vector<1x64x128xf32> to vector<64x128xf32>
    %cst_38 = arith.constant dense<0.000000e+00> : vector<16x128xf32>
    %75 = tpu.matmul %47, %74, %cst_38 {dimension_numbers = #tpu.dot_dimension_numbers<[1], [0], [0], [1], [0, 0, 1, 1], [], []>} : vector<16x64xf32>, vector<64x128xf32>, vector<16x128xf32> -> vector<16x128xf32>
    %c2_39 = arith.constant 2 : index
    %c0_40 = arith.constant 0 : index
    %c0_41 = arith.constant 0 : index
    %76 = vector.load %arg4[%c2_39, %c0_40, %c0_41] : memref<3x64x128xf32, #tpu.memory_space<vmem>>, vector<1x64x128xf32>
    %77 = vector.shape_cast %76 : vector<1x64x128xf32> to vector<64x128xf32>
    %cst_42 = arith.constant dense<0.000000e+00> : vector<16x128xf32>
    %78 = tpu.matmul %47, %77, %cst_42 {dimension_numbers = #tpu.dot_dimension_numbers<[1], [0], [0], [1], [0, 0, 1, 1], [], []>} : vector<16x64xf32>, vector<64x128xf32>, vector<16x128xf32> -> vector<16x128xf32>
    %c1_i32_43 = arith.constant 1 : i32
    %79 = tpu.dynamic_rotate %72 by %c1_i32_43 dim 0 : vector<16x128xf32>, i32 -> vector<16x128xf32>
    %cst_44 = arith.constant 0.000000e+00 : f32
    %80 = vector.broadcast %cst_44 : f32 to vector<16x128xf32>
    %81 = arith.select %67, %79, %80 : vector<16x128xi1>, vector<16x128xf32>
    %82 = arith.addf %75, %81 : vector<16x128xf32>
    %c15_i32_45 = arith.constant 15 : i32
    %83 = tpu.dynamic_rotate %78 by %c15_i32_45 dim 0 : vector<16x128xf32>, i32 -> vector<16x128xf32>
    %cst_46 = arith.constant 0.000000e+00 : f32
    %84 = vector.broadcast %cst_46 : f32 to vector<16x128xf32>
    %85 = arith.select %69, %83, %84 : vector<16x128xi1>, vector<16x128xf32>
    %86 = arith.addf %82, %85 : vector<16x128xf32>
    %87 = vector.broadcast %48 : vector<1x128xf32> to vector<16x128xf32>
    %88 = arith.addf %86, %87 : vector<16x128xf32>
    %89 = arith.negf %88 : vector<16x128xf32>
    %90 = math.exp %89 : vector<16x128xf32>
    %cst_47 = arith.constant 1.000000e+00 : f32
    %91 = vector.broadcast %cst_47 : f32 to vector<16x128xf32>
    %92 = arith.addf %91, %90 : vector<16x128xf32>
    %93 = arith.divf %91, %92 : vector<16x128xf32>
    %94 = arith.mulf %88, %93 : vector<16x128xf32>
    %95 = arith.addf %94, %0 : vector<16x128xf32>
    %c0_48 = arith.constant 0 : index
    %c0_49 = arith.constant 0 : index
    %96 = vector.load %arg6[%c0_48, %c0_49] : memref<16x128xf32, #tpu.memory_space<vmem>>, vector<16x128xf32>
    tpu.vector_store %arg6[%c0_48, %c0_49], %95 {strides = array<i32>} : memref<16x128xf32, #tpu.memory_space<vmem>>, vector<16x128xf32>,
    return
  }
  func.func @transform_0(%arg0: i32) -> (i32, i32) {
    %c0_i32 = arith.constant 0 : i32
    %c0_i32_0 = arith.constant 0 : i32
    return %arg0, %c0_i32 : i32, i32
  }
  func.func @transform_1(%arg0: i32) -> (i32, i32, i32) {
    %c0_i32 = arith.constant 0 : i32
    %c0_i32_0 = arith.constant 0 : i32
    %c0_i32_1 = arith.constant 0 : i32
    %c0_i32_2 = arith.constant 0 : i32
    return %c0_i32, %c0_i32_0, %c0_i32_1 : i32, i32, i32
  }
  func.func @transform_2(%arg0: i32) -> (i32, i32) {
    %c0_i32 = arith.constant 0 : i32
    %c0_i32_0 = arith.constant 0 : i32
    %c0_i32_1 = arith.constant 0 : i32
    return %c0_i32, %c0_i32_0 : i32, i32
  }
  func.func @transform_3(%arg0: i32) -> (i32, i32, i32) {
    %c0_i32 = arith.constant 0 : i32
    %c0_i32_0 = arith.constant 0 : i32
    %c0_i32_1 = arith.constant 0 : i32
    %c0_i32_2 = arith.constant 0 : i32
    return %c0_i32, %c0_i32_0, %c0_i32_1 : i32, i32, i32
  }
  func.func @transform_4(%arg0: i32) -> (i32, i32) {
    %c0_i32 = arith.constant 0 : i32
    %c0_i32_0 = arith.constant 0 : i32
    %c0_i32_1 = arith.constant 0 : i32
    return %c0_i32, %c0_i32_0 : i32, i32
  }
  func.func @transform_5(%arg0: i32) -> (i32, i32) {
    %c0_i32 = arith.constant 0 : i32
    %c0_i32_0 = arith.constant 0 : i32
    return %arg0, %c0_i32 : i32, i32
  }
}

</mosaic_0001>

<bundles_post_ra>
// kernel: tpu_custom_call.1
= control target key start
LH: loop header
LB: loop body
LE: loop exit
PB: predicated region body
PF: predicated region fallthrough
CT: control target
= control target key end

     0   :  { %10 = vsyncpa [#allocation3], 0  ;;  %s1949_s0 = inlined_call_operand.vmem [shape: f32[32,128], index: 0, kind: input, shape index: {}]   ;;  %s1950_s1 = inlined_call_operand.vmem [shape: f32[3,128,64], index: 1, kind: input, shape index: {}]   ;;  %s1951_s2 = inlined_call_operand.vmem [shape: f32[1,64], index: 2, kind: input, shape index: {}]   ;;  %s1952_s3 = inlined_call_operand.vmem [shape: f32[3,64,128], index: 3, kind: input, shape index: {}]   ;;  %s1953_s4 = inlined_call_operand.vmem [shape: f32[1,128], index: 4, kind: input, shape index: {}]   ;;  %s1954_s5 = inlined_call_operand.hbm [shape: f32[32,128], index: 5, kind: output, shape index: {}]  }
   0x1   :  { %12 = vsyncpa [#allocation3 + $0x1], 0  ;;  %s1565_s18 = smov 0   ;;  %s1567_s19 = smov 0  }
   0x2   :  { %s1569_s20 = smov 0   ;;  %s1571_s21 = smov 0  }
   0x3 LB: > { %s1586_s22 = sadd.s32 4294967295, %s1530_s21   ;;  %s948_s23 = sadd.s32 4294967294, %s1530_s21   ;;  %s1530_s21 = sphi %s1571_s21, %s1964_s21   ;;  %s1526_s20 = sphi %s1569_s20, %s1963_s20   ;;  %s1522_s19 = sphi %s1567_s19, %s1962_s19   ;;  %s1518_s18 = sphi %s1565_s18, %s1961_s18  }
   0x4   : > { %s1590_s24 = sadd.s32 1, %s1530_s21   ;;  %s135_s25 = sadd.s32 1, %s1526_s20 }
   0x5   : > { %s132_s26 = ssub.s32 %s1530_s21, %s1590_s24  ;;  %p145_p0 = scmp.ne.s32.totalorder %s1526_s20, %s1522_s19 }
   0x6   : > { %p133_p1 = scmp.eq.s32.totalorder %s132_s26, 0  ;;  %p146_p2 = scmp.eq.s32.totalorder %s1586_s22, 1 }
   0x7   : > { %p151_p3 = scmp.ne.s32.totalorder %s1522_s19, %s1518_s18  ;;  %p152_p4 = scmp.eq.s32.totalorder %s948_s23, 1 }
   0x8   : > { %s1601_s27 = scalar_select %p133_p1, %s1526_s20, %s135_s25  }
   0x9   : > { %p1603_p5 = por %p146_p2, %p145_p0  ;;  %p1607_p6 = por %p152_p4, %p151_p3 }
   0xa   : > { %p951_p7 = scmp.ge.s32.totalorder %s1530_s21, 1  ;;  %p191_p8 = scmp.lt.s32.totalorder %s1530_s21, 3 }
   0xc   : > { %p192_p9 = pnand %p951_p7, %p191_p8 }
   0xd   : > { %v260_v0 = vld [vmem:[%s1950_s1] sm:$0xff] (!%p192_p9)  ;;  %v261_v1 = vld [vmem:[%s1950_s1 + $0x8] sm:$0xff] (!%p192_p9)  ;;  %v262_v2 = vld [vmem:[%s1950_s1 + $0x10] sm:$0xff] (!%p192_p9)  ;;  %s953_s11 = sshll.u32 (!%p192_p9), %s1586_s22, 1  ;;  %vm582_vm4 = vcmask (!%p192_p9), 523264   ;;  %s216_s17 = sand.u32 (!%p192_p9), 1, %s1522_s19  }
   0xe   : > { %195 = sbr.rel (%p192_p9) target bundleno = 611 (0x263), region = 40  ;;  %v1267_v3 = vpack.c.bf16 (!%p192_p9), %v261_v1, %v260_v0  ;;  %v263_v4 = vld [vmem:[%s1950_s1 + $0x18] sm:$0xff] (!%p192_p9)  ;;  %p220_p10 = scmp.lt.s32.totalorder (!%p192_p9), %s953_s11, 3  ;;  %v264_v6 = vld [vmem:[%s1950_s1 + $0x20] sm:$0xff] (!%p192_p9)  ;;  %v265_v7 = vld [vmem:[%s1950_s1 + $0x28] sm:$0xff] (!%p192_p9) }
   0xf   : > { %v1271_v5 = vpack.c.bf16 (!%p192_p9), %v263_v4, %v262_v2  ;;  %v1275_v8 = vpack.c.bf16 (!%p192_p9), %v265_v7, %v264_v6  ;;  %v971_v9 = vld [vmem:[%s1950_s1 + $0x100] sm:$0xff] (!%p192_p9)  ;;  %v972_v10 = vld [vmem:[%s1950_s1 + $0x108] sm:$0xff] (!%p192_p9)  ;;  %v266_v11 = vld [vmem:[%s1950_s1 + $0x30] sm:$0xff] (!%p192_p9)  ;;  %s952_s23 = sshll.u32 (!%p192_p9), %s216_s17, 4  ;;  %s1020_s25 = sshll.u32 (!%p192_p9), %s1586_s22, 8 }
  0x10   : > { %1268 = vmatprep.subr.bf16.mxu0 (!%p192_p9), %v1267_v3  ;;  %v267_v12 = vld [vmem:[%s1950_s1 + $0x38] sm:$0xff] (!%p192_p9)  ;;  %v1299_v13 = vpack.c.bf16 (!%p192_p9), %v972_v10, %v971_v9  ;;  %v973_v14 = vld [vmem:[%s1950_s1 + $0x110] sm:$0xff] (!%p192_p9)  ;;  %v975_v18 = vld [vmem:[%s1950_s1 + $0x120] sm:$0xff] (!%p192_p9)  ;;  %s218_s26 = scalar_lea.vmem (!%p192_p9), [#allocation2], %s952_s23  ;;  %s1903_s8 = scalar_lea.hbm (!%p192_p9), %s1954_s5, %s1020_s25 }
  0x11   : > { %1270 = vmatpush3.bf16.msra.mxu0 (!%p192_p9), %v1267_v3  ;;  %v974_v16 = vld [vmem:[%s1950_s1 + $0x118] sm:$0xff] (!%p192_p9)  ;;  %v1279_v19 = vpack.c.bf16 (!%p192_p9), %v267_v12, %v266_v11  ;;  %v976_v20 = vld [vmem:[%s1950_s1 + $0x128] sm:$0xff] (!%p192_p9)  ;;  %v268_v21 = vld [vmem:[%s1950_s1 + $0x40] sm:$0xff] (!%p192_p9)  ;;  %s886_s30 = sshll.u32 (!%p192_p9), %s218_s26, 4  ;;  %s1908_s22 = scalar_lea.sflag (!%p192_p9), [#allocation3], %s216_s17  ;;  %s1905_s30 = int_to_ptr.vmem [resolvable:$true] %s886_s30 }
  0x12   : > { %1272 = vmatprep.subr.bf16.mxu0 (!%p192_p9), %v1271_v5  ;;  %1300 = vmatprep.subr.bf16.mxu1 (!%p192_p9), %v1299_v13  ;;  %v1303_v17 = vpack.c.bf16 (!%p192_p9), %v974_v16, %v973_v14  ;;  %v269_v22 = vld [vmem:[%s1950_s1 + $0x48] sm:$0xff] (!%p192_p9)  ;;  %v1307_v23 = vpack.c.bf16 (!%p192_p9), %v976_v20, %v975_v18  ;;  %v977_v24 = vld [vmem:[%s1950_s1 + $0x130] sm:$0xff] (!%p192_p9)  ;;  %v978_v25 = vld [vmem:[%s1950_s1 + $0x138] sm:$0xff] (!%p192_p9)  ;;  %s1532_s9 = smov (!%p192_p9), [#allocation2]  }
  0x13   : > { %1302 = vmatpush3.bf16.msra.mxu1 (!%p192_p9), %v1299_v13  ;;  %v1283_v26 = vpack.c.bf16 (!%p192_p9), %v269_v22, %v268_v21  ;;  %v270_v27 = vld [vmem:[%s1950_s1 + $0x50] sm:$0xff] (!%p192_p9)  ;;  %v271_v28 = vld [vmem:[%s1950_s1 + $0x58] sm:$0xff] (!%p192_p9)  ;;  %v1311_v29 = vpack.c.bf16 (!%p192_p9), %v978_v25, %v977_v24  ;;  %v979_v30 = vld [vmem:[%s1950_s1 + $0x140] sm:$0xff] (!%p192_p9)  ;;  %s1472_s10 = sshll.u32 (!%p192_p9), %s1532_s9, 4  ;;  %s1473_s10 = int_to_ptr.vmem [resolvable:$false] %s1472_s10 }
  0x14   : > { %1304 = vmatprep.subr.bf16.mxu1 (!%p192_p9), %v1303_v17  ;;  %v980_v31 = vld [vmem:[%s1950_s1 + $0x148] sm:$0xff] (!%p192_p9)  ;;  %v1287_v32 = vpack.c.bf16 (!%p192_p9), %v271_v28, %v270_v27  ;;  %v272_v33 = vld [vmem:[%s1950_s1 + $0x60] sm:$0xff] (!%p192_p9)  ;;  %v981_v36 = vld [vmem:[%s1950_s1 + $0x150] sm:$0xff] (!%p192_p9)  ;;  %s1474_s12 = scalar_lea.vmem (!%p192_p9), %s1473_s10, 512  ;;  %p1475_p0 = scmp.lt.s32.totalorder (!%p192_p9), %s1905_s30, %s1473_s10 }
  0x15   : > { %s1966_s11 = smov (!%p220_p10, %s953_s11), 3  ;;  %1274 = vmatpush3.bf16.msra.mxu0 %v1271_v5  ;;  %v273_v34 = vld [vmem:[%s1950_s1 + $0x68] sm:$0xff]  ;;  %v1315_v35 = vpack.c.bf16 %v980_v31, %v979_v30  ;;  %v982_v37 = vld [vmem:[%s1950_s1 + $0x158] sm:$0xff]  ;;  %v274_v39 = vld [vmem:[%s1950_s1 + $0x70] sm:$0xff] }
  0x16   : > { %s954_s6 = sshll.u32 %s1966_s11, 3  ;;  %1276 = vmatprep.subr.bf16.mxu0 %v1275_v8  ;;  %v1291_v38 = vpack.c.bf16 %v273_v34, %v272_v33  ;;  %v275_v40 = vld [vmem:[%s1950_s1 + $0x78] sm:$0xff]  ;;  %v1319_v41 = vpack.c.bf16 %v982_v37, %v981_v36  ;;  %v983_v42 = vld [vmem:[%s1950_s1 + $0x160] sm:$0xff]  ;;  %v984_v43 = vld [vmem:[%s1950_s1 + $0x168] sm:$0xff] }
  0x17   : > { %s1647_s14 = scalar_lea.vmem %s1949_s0, %s954_s6  ;;  %1306 = vmatpush3.bf16.msra.mxu1 %v1303_v17  ;;  %v1295_v44 = vpack.c.bf16 %v275_v40, %v274_v39  ;;  %v955_v45 = vld [vmem:[%s1950_s1 + $0x80] sm:$0xff]  ;;  %v956_v46 = vld [vmem:[%s1950_s1 + $0x88] sm:$0xff]  ;;  %v1323_v47 = vpack.c.bf16 %v984_v43, %v983_v42  ;;  %v985_v48 = vld [vmem:[%s1950_s1 + $0x170] sm:$0xff] }
  0x18   : > { %v1653_v15 = vld [vmem:[%s1647_s14] sm:$0xff]  ;;  %1308 = vmatprep.subr.bf16.mxu1 %v1307_v23  ;;  %v986_v49 = vld [vmem:[%s1950_s1 + $0x178] sm:$0xff]  ;;  %v1331_v50 = vpack.c.bf16 %v956_v46, %v955_v45  ;;  %v957_v51 = vld [vmem:[%s1950_s1 + $0x90] sm:$0xff] }
  0x19   : > { %1137 = vmatprep.mubr.f32.mxu0 %v1653_v15  ;;  %1172 = vmatprep.mubr.f32.mxu1 %v1653_v15  ;;  %v958_v52 = vld [vmem:[%s1950_s1 + $0x98] sm:$0xff]  ;;  %v1327_v53 = vpack.c.bf16 %v986_v49, %v985_v48  ;;  %v1733_v54 = vld [vmem:[%s1647_s14 + $0x8] sm:$0xff]  ;;  %v959_v56 = vld [vmem:[%s1950_s1 + $0xa0] sm:$0xff]  ;;  %s1468_s14 = scalar_lea.vmem %s1905_s30, 256 }
  0x1a   : > { %1278 = vmatpush3.bf16.msra.mxu0 %v1275_v8  ;;  %v1335_v55 = vpack.c.bf16 %v958_v52, %v957_v51  ;;  %v960_v57 = vld [vmem:[%s1950_s1 + $0xa8] sm:$0xff]  ;;  %v961_v59 = vld [vmem:[%s1950_s1 + $0xb0] sm:$0xff]  ;;  %v962_v60 = vld [vmem:[%s1950_s1 + $0xb8] sm:$0xff]  ;;  %p1469_p11 = scmp.ne.s32.totalorder %s1905_s30, %s1468_s14  ;;  %p1476_p1 = scmp.lt.s32.totalorder %s1474_s12, %s1468_s14 }
  0x1b   : > { %1280 = vmatprep.subr.bf16.mxu0 %v1279_v19  ;;  %1310 = vmatpush3.bf16.msra.mxu1 %v1307_v23  ;;  %v1339_v58 = vpack.c.bf16 %v960_v57, %v959_v56  ;;  %v1343_v61 = vpack.c.bf16 %v962_v60, %v961_v59  ;;  %v963_v62 = vld [vmem:[%s1950_s1 + $0xc0] sm:$0xff]  ;;  %v964_v63 = vld [vmem:[%s1950_s1 + $0xc8] sm:$0xff]  ;;  %v965_v1 = vld [vmem:[%s1950_s1 + $0xd0] sm:$0xff] }
  0x1c   : > { %1312 = vmatprep.subr.bf16.mxu1 %v1311_v29  ;;  %v1347_v0 = vpack.c.bf16 %v964_v63, %v963_v62  ;;  %v966_v2 = vld [vmem:[%s1950_s1 + $0xd8] sm:$0xff]  ;;  %v967_v4 = vld [vmem:[%s1950_s1 + $0xe0] sm:$0xff]  ;;  %v968_v5 = vld [vmem:[%s1950_s1 + $0xe8] sm:$0xff]  ;;  %p1470_p12 = pnand %p1469_p11, %p1603_p5  ;;  %p1477_p2 = por %p1476_p1, %p1475_p0 }
  0x1d   : > { %v1351_v3 = vpack.c.bf16 %v966_v2, %v965_v1  ;;  %v1355_v6 = vpack.c.bf16 %v968_v5, %v967_v4  ;;  %v969_v7 = vld [vmem:[%s1950_s1 + $0xf0] sm:$0xff]  ;;  %v970_v8 = vld [vmem:[%s1950_s1 + $0xf8] sm:$0xff]  ;;  %v574_v10 = vld [vmem:[%s1952_s3] sm:$0xff] }
  0x1e   : > { %1282 = vmatpush3.bf16.msra.mxu0 %v1279_v19  ;;  %v1359_v9 = vpack.c.bf16 %v970_v8, %v969_v7  ;;  %v575_v11 = vld [vmem:[%s1952_s3 + $0x8] sm:$0xff]  ;;  %v992_v13 = vld [vmem:[%s1952_s3 + $0x40] sm:$0xff]  ;;  %v576_v17 = vld [vmem:[%s1952_s3 + $0x10] sm:$0xff]  ;;  %p1471_p13 = pneg %p1470_p12 }
  0x1f   : > { %1284 = vmatprep.subr.bf16.mxu0 %v1283_v26  ;;  %1314 = vmatpush3.bf16.msra.mxu1 %v1311_v29  ;;  %v1363_v12 = vpack.c.bf16 %v575_v11, %v574_v10  ;;  %v993_v14 = vld [vmem:[%s1952_s3 + $0x48] sm:$0xff]  ;;  %v577_v18 = vld [vmem:[%s1952_s3 + $0x18] sm:$0xff]  ;;  %v994_v20 = vld [vmem:[%s1952_s3 + $0x50] sm:$0xff] }
  0x20   : > { %1316 = vmatprep.subr.bf16.mxu1 %v1315_v35  ;;  %v1395_v16 = vpack.c.bf16 %v993_v14, %v992_v13  ;;  %v1367_v19 = vpack.c.bf16 %v577_v18, %v576_v17  ;;  %v995_v21 = vld [vmem:[%s1952_s3 + $0x58] sm:$0xff]  ;;  %v578_v23 = vld [vmem:[%s1952_s3 + $0x20] sm:$0xff]  ;;  %v579_v24 = vld [vmem:[%s1952_s3 + $0x28] sm:$0xff]  ;;  %p1478_p3 = pnand %p1477_p2, %p1471_p13 }
  0x21   : > { %v1399_v22 = vpack.c.bf16 %v995_v21, %v994_v20  ;;  %v1371_v25 = vpack.c.bf16 %v579_v24, %v578_v23  ;;  %v997_v27 = vld [vmem:[%s1952_s3 + $0x68] sm:$0xff]  ;;  %v580_v29 = vld [vmem:[%s1952_s3 + $0x30] sm:$0xff]  ;;  %v581_v30 = vld [vmem:[%s1952_s3 + $0x38] sm:$0xff] }
  0x22   : > { %1286 = vmatpush3.bf16.msra.mxu0 %v1283_v26  ;;  %v996_v26 = vld [vmem:[%s1952_s3 + $0x60] sm:$0xff]  ;;  %v1375_v31 = vpack.c.bf16 %v581_v30, %v580_v29  ;;  %v999_v33 = vld [vmem:[%s1952_s3 + $0x78] sm:$0xff]  ;;  %v1001_v36 = vld [vmem:[%s1952_s3 + $0x88] sm:$0xff] }
  0x23   : > { %1288 = vmatprep.subr.bf16.mxu0 %v1287_v32  ;;  %1318 = vmatpush3.bf16.msra.mxu1 %v1315_v35  ;;  %v1403_v28 = vpack.c.bf16 %v997_v27, %v996_v26  ;;  %v1000_v35 = vld [vmem:[%s1952_s3 + $0x80] sm:$0xff]  ;;  %v1003_v13 = vld [vmem:[%s1952_s3 + $0x98] sm:$0xff]  ;;  %v1005_v20 = vld [vmem:[%s1952_s3 + $0xa8] sm:$0xff] }
  0x24   : > { %1320 = vmatprep.subr.bf16.mxu1 %v1319_v41  ;;  %v1379_v37 = vpack.c.bf16 %v1001_v36, %v1000_v35  ;;  %v987_v63 = vld [vmem:[%s1951_s2] ss:$0 sm:$0xff]  ;;  %v1007_v23 = vld [vmem:[%s1952_s3 + $0xb8] sm:$0xff] }
  0x26   : > { %1290 = vmatpush3.bf16.msra.mxu0 %v1287_v32  ;;  %v998_v32 = vld [vmem:[%s1952_s3 + $0x70] sm:$0xff] }
  0x27   : > { %1292 = vmatprep.subr.bf16.mxu0 %v1291_v38  ;;  %1322 = vmatpush3.bf16.msra.mxu1 %v1319_v41  ;;  %v1407_v34 = vpack.c.bf16 %v999_v33, %v998_v32 }
  0x28   : > { %1324 = vmatprep.subr.bf16.mxu1 %v1323_v47 }
  0x2a   : > { %1294 = vmatpush3.bf16.msra.mxu0 %v1291_v38  ;;  %v229_v38 = vlaneseq }
  0x2b   : > { %1296 = vmatprep.subr.bf16.mxu0 %v1295_v44  ;;  %1326 = vmatpush3.bf16.msra.mxu1 %v1323_v47 }
  0x2c   : > { %1328 = vmatprep.subr.bf16.mxu1 %v1327_v53  ;;  %v1829_v39 = vshrl.u32 %v229_v38, 7 }
  0x2e   : > { %1298 = vmatpush3.bf16.msra.mxu0 %v1295_v44  ;;  %vm462_vm0 = vcmp.lt.s32.totalorder %v1829_v39, 1  ;;  %vm544_vm1 = vcmp.lt.s32.totalorder %v1829_v39, 7  ;;  %v231_v52 = vadd.s32 8, %v1829_v39 }
  0x2f   : > { %1332 = vmatprep.subr.bf16.mxu0 %v1331_v50  ;;  %1330 = vmatpush3.bf16.msra.mxu1 %v1327_v53 }
  0x30   : > { %1364 = vmatprep.subr.bf16.mxu1 %v1363_v12  ;;  %v243_v53 = vand.u32 15, %v231_v52 }
  0x31   : > { %1138 = vmatmul.mubr.f32.vlgmr.msra.gmra.mrb[0].mxu0 %v1733_v54 }
  0x32   : > { %1334 = vmatpush3.bf16.msra.mxu0 %v1331_v50  ;;  %1207 = vmatprep.mubr.f32.mxu0 %v1653_v15  ;;  %vm1843_vm2 = vcmp.ne.s32.totalorder %v243_v53, 15 }
  0x33   : > { %1336 = vmatprep.subr.bf16.mxu0 %v1335_v55  ;;  %1173 = vmatmul.mubr.f32.vlgmr.msra.gmra.mrb[0].mxu1 %v1733_v54 }
  0x34   : > { %1366 = vmatpush3.bf16.msra.mxu1 %v1363_v12  ;;  %v1002_v12 = vld [vmem:[%s1952_s3 + $0x90] sm:$0xff] }
  0x35   : > { %1368 = vmatprep.subr.bf16.mxu1 %v1367_v19  ;;  %v1383_v18 = vpack.c.bf16 %v1003_v13, %v1002_v12 }
  0x36   : > { %1338 = vmatpush3.bf16.msra.mxu0 %v1335_v55  ;;  %v236_v55 = vand.u32 15, %v1829_v39 }
  0x37   : > { %1340 = vmatprep.subr.bf16.mxu0 %v1339_v58 }
  0x38   : > { %1370 = vmatpush3.bf16.msra.mxu1 %v1367_v19  ;;  %vm1847_vm3 = vcmp.ne.s32.totalorder %v236_v55, 0  ;;  %v1004_v19 = vld [vmem:[%s1952_s3 + $0xa0] sm:$0xff] }
  0x39   : > { %1372 = vmatprep.subr.bf16.mxu1 %v1371_v25  ;;  %v1387_v21 = vpack.c.bf16 %v1005_v20, %v1004_v19 }
  0x3a   : > { %1342 = vmatpush3.bf16.msra.mxu0 %v1339_v58 }
  0x3b   : > { %1344 = vmatprep.subr.bf16.mxu0 %v1343_v61 }
  0x3c   : > { %1374 = vmatpush3.bf16.msra.mxu1 %v1371_v25 }
  0x3d   : > { %1376 = vmatprep.subr.bf16.mxu1 %v1375_v31 }
  0x3e   : > { %1346 = vmatpush3.bf16.msra.mxu0 %v1343_v61 }
  0x3f   : > { %1348 = vmatprep.subr.bf16.mxu0 %v1347_v0 }
  0x40   : > { %1378 = vmatpush3.bf16.msra.mxu1 %v1375_v31 }
  0x41   : > { %1380 = vmatprep.subr.bf16.mxu1 %v1379_v37 }
  0x42   : > { %1350 = vmatpush3.bf16.msra.mxu0 %v1347_v0 }
  0x43   : > { %1352 = vmatprep.subr.bf16.mxu0 %v1351_v3 }
  0x46   : > { %1354 = vmatpush3.bf16.msra.mxu0 %v1351_v3 }
  0x47   : > { %1356 = vmatprep.subr.bf16.mxu0 %v1355_v6 }
  0x4a   : > { %1358 = vmatpush3.bf16.msra.mxu0 %v1355_v6 }
  0x4b   : > { %1360 = vmatprep.subr.bf16.mxu0 %v1359_v9 }
  0x4e   : > { %1362 = vmatpush3.bf16.msra.mxu0 %v1359_v9 }
  0x4f   : > { %1396 = vmatprep.subr.bf16.mxu0 %v1395_v16 }
  0x51   : > { %1208 = vmatmul.mubr.f32.vlgmr.msra.gmra.mrb[2].mxu0 %v1733_v54 }
  0x52   : > { %1398 = vmatpush3.bf16.msra.mxu0 %v1395_v16 }
  0x53   : > { %1400 = vmatprep.subr.bf16.mxu0 %v1399_v22 }
  0x56   : > { %1402 = vmatpush3.bf16.msra.mxu0 %v1399_v22  ;;  %v1006_v22 = vld [vmem:[%s1952_s3 + $0xb0] sm:$0xff] }
  0x57   : > { %1404 = vmatprep.subr.bf16.mxu0 %v1403_v28  ;;  %v1391_v24 = vpack.c.bf16 %v1007_v23, %v1006_v22 }
  0x5a   : > { %1406 = vmatpush3.bf16.msra.mxu0 %v1403_v28 }
  0x5b   : > { %1408 = vmatprep.subr.bf16.mxu0 %v1407_v34 }
  0x5e   : > { %1410 = vmatpush3.bf16.msra.mxu0 %v1407_v34 }
 0x104   : > { %v1139_v40 = vpop.f32.mrb[0].mxu0 }
 0x105   : > { %v461_v41 = vrot.slane %v1139_v40, 7  ;;  %v342_v42 = vpop.f32.mrb[1].mxu0 }
 0x106   : > { %v460_v43 = vrot.slane %v342_v42, 7  ;;  %v1174_v46 = vpop.f32.mrb[0].mxu1 }
 0x107   : > { %v543_v47 = vrot.slane %v1174_v46, 1  ;;  %v451_v48 = vpop.f32.mrb[1].mxu1 }
 0x108   : > { %v463_v44 = vsel %vm462_vm0, %v460_v43, %v461_v41  ;;  %v464_v45 = vsel %vm462_vm0, %v461_v41, %v460_v43  ;;  %v542_v49 = vrot.slane %v451_v48, 1  ;;  %v1012_v41 = vld [vmem:[%s1953_s4] ss:$0 sm:$0xff] }
 0x109   : > { %v465_v61 = vsel %vm1847_vm3, %v464_v45, 0.0 }
 0x10a   : > { %v546_v50 = vsel %vm544_vm1, %v543_v47, %v542_v49  ;;  %v545_v51 = vsel %vm544_vm1, %v542_v49, %v543_v47 }
 0x10b   : > { %v548_v59 = vsel %vm1843_vm2, %v546_v50, 0.0 }
 0x124   : > { %v1209_v58 = vpop.f32.mrb[2].mxu0 }
 0x125   : > { %v539_v60 = vadd.f32 %v1209_v58, %v463_v44  ;;  %v533_v62 = vpop.f32.mrb[3].mxu0 }
 0x126   : > { %v534_v0 = vadd.f32 %v533_v62, %v465_v61 }
 0x127   : > { %v550_v1 = vadd.f32 %v548_v59, %v539_v60 }
 0x128   : > { %v549_v2 = vadd.f32 %v545_v51, %v534_v0 }
 0x129   : > { %v558_v3 = vadd.f32 %v987_v63, %v550_v1 }
 0x12a   : > { %v557_v4 = vadd.f32 %v987_v63, %v549_v2 }
 0x12b   : > { %v989_v5 = vmul.f32 -1.442695, %v558_v3 }
 0x12c   : > { %v988_v6 = vmul.f32 -1.442695, %v557_v4 }
 0x12d   : > { %1452 = vpow2.f32 %v989_v5 }
 0x12e   : > { %1454 = vpow2.f32 %v988_v6 }
 0x137   : > { %v1453_v7 = vpop.eup %1452 }
 0x138   : > { %v1455_v8 = vpop.eup %1454  ;;  %v566_v9 = vadd.f32 1.0, %v1453_v7 }
 0x139   : > { %v565_v10 = vadd.f32 1.0, %v1455_v8 }
 0x13a   : > { %1456 = vrcp.f32 %v566_v9 }
 0x13b   : > { %1458 = vrcp.f32 %v565_v10 }
 0x144   : > { %v1457_v11 = vpop.eup %1456 }
 0x145   : > { %v1459_v14 = vpop.eup %1458  ;;  %v572_v17 = vmul.f32 %v1457_v11, %v558_v3 }
 0x146   : > { %v571_v16 = vmul.f32 %v1459_v14, %v557_v4 }
 0x148   : > { %1226 = vmatprep.mubr.msk.f32.mxu1 %vm582_vm4, %v571_v16  ;;  %1264 = vmatprep.mubr.msk.f32.mxu0 %vm582_vm4, %v571_v16 }
 0x149   : > { %1227 = vmatmul.mubr.msk.f32.vlgmr.msra.gmra.mrb[2].mxu1 %vm582_vm4, %v572_v17  ;;  %1265 = vmatmul.mubr.msk.f32.vlgmr.msra.gmra.mrb[4].mxu0 %vm582_vm4, %v572_v17 }
 0x14a   : > { %1382 = vmatpush3.bf16.msra.mxu1 %v1379_v37  ;;  %1245 = vmatprep.mubr.msk.f32.mxu1 %vm582_vm4, %v571_v16 }
 0x14b   : > { %1384 = vmatprep.subr.bf16.mxu1 %v1383_v18 }
 0x14e   : > { %1386 = vmatpush3.bf16.msra.mxu1 %v1383_v18 }
 0x14f   : > { %1388 = vmatprep.subr.bf16.mxu1 %v1387_v21 }
 0x152   : > { %1390 = vmatpush3.bf16.msra.mxu1 %v1387_v21 }
 0x153   : > { %1392 = vmatprep.subr.bf16.mxu1 %v1391_v24 }
 0x156   : > { %1394 = vmatpush3.bf16.msra.mxu1 %v1391_v24 }
 0x159   : > { %1246 = vmatmul.mubr.msk.f32.vlgmr.msra.gmra.mrb[4].mxu1 %vm582_vm4, %v572_v17 }
 0x21c   : > { %v1228_v25 = vpop.f32.mrb[2].mxu1  ;;  %v1266_v26 = vpop.f32.mrb[4].mxu0 }
 0x21d   : > { %v758_v27 = vrot.slane %v1228_v25, 7  ;;  %v655_v28 = vpop.f32.mrb[3].mxu1  ;;  %v829_v29 = vpop.f32.mrb[5].mxu0 }
 0x21e   : > { %v757_v30 = vrot.slane %v655_v28, 7 }
 0x220   : > { %v759_v31 = vsel %vm462_vm0, %v757_v30, %v758_v27  ;;  %v760_v32 = vsel %vm462_vm0, %v758_v27, %v757_v30 }
 0x221   : > { %v835_v33 = vadd.f32 %v1266_v26, %v759_v31  ;;  %v761_v34 = vsel %vm1847_vm3, %v760_v32, 0.0 }
 0x222   : > { %v830_v35 = vadd.f32 %v829_v29, %v761_v34 }
 0x22c   : > { %v1247_v36 = vpop.f32.mrb[4].mxu1 }
 0x22d   : > { %v839_v37 = vrot.slane %v1247_v36, 1  ;;  %v748_v38 = vpop.f32.mrb[5].mxu1 }
 0x22e   : > { %v838_v40 = vrot.slane %v748_v38, 1 }
 0x230   : > { %v840_v42 = vsel %vm544_vm1, %v838_v40, %v839_v37  ;;  %v841_v43 = vsel %vm544_vm1, %v839_v37, %v838_v40 }
 0x231   : > { %v843_v44 = vsel %vm1843_vm2, %v841_v43, 0.0  ;;  %v844_v45 = vadd.f32 %v840_v42, %v830_v35 }
 0x232   : > { %v845_v46 = vadd.f32 %v843_v44, %v835_v33 }
 0x233   : > { %v852_v47 = vadd.f32 %v1012_v41, %v844_v45 }
 0x234   : > { %v853_v48 = vadd.f32 %v1012_v41, %v845_v46 }
 0x235   : > { %v1013_v49 = vmul.f32 -1.442695, %v852_v47 }
 0x236   : > { %v1014_v50 = vmul.f32 -1.442695, %v853_v48 }
 0x237   : > { %1460 = vpow2.f32 %v1013_v49 }
 0x238   : > { %1462 = vpow2.f32 %v1014_v50 }
 0x241   : > { %v1461_v51 = vpop.eup %1460 }
 0x242   : > { %v1463_v52 = vpop.eup %1462  ;;  %v860_v53 = vadd.f32 1.0, %v1461_v51 }
 0x243   : > { %v861_v55 = vadd.f32 1.0, %v1463_v52 }
 0x244   : > { %1464 = vrcp.f32 %v860_v53 }
 0x245   : > { %1466 = vrcp.f32 %v861_v55 }
 0x24e   : > { %v1465_v39 = vpop.eup %1464 }
 0x24f   : > { %v1467_v56 = vpop.eup %1466  ;;  %v866_v57 = vmul.f32 %v1465_v39, %v852_v47 }
 0x250   : > { %v867_v58 = vmul.f32 %v1467_v56, %v853_v48 }
 0x251   : > { %v868_v59 = vadd.f32 %v866_v57, %v1653_v15 }
 0x252   : > { %v869_v60 = vadd.f32 %v867_v58, %v1733_v54 }
 0x253   : > { %870 = vst [vmem:[%s218_s26] sm:$0xff] %v868_v59 }
 0x254   : > { %871 = vst [vmem:[%s218_s26 + $0x8] sm:$0xff] %v869_v60 }
 0x255   : > { %1481 = shalt.err (!%p1478_p3)
}
 0x256   : > { %s1482_s13 = scalar_lea.hbm %s1903_s8, 256  ;;  %s1486_s11 = scalar_lea.hbm %s1954_s5, 512 }
 0x257   : > { %p1483_p4 = scmp.ne.s32.totalorder %s1903_s8, %s1482_s13  ;;  %p1487_p9 = scmp.lt.u32.totalorder %s1903_s8, %s1954_s5 }
 0x258   : > { %p1488_p10 = scmp.lt.u32.totalorder %s1486_s11, %s1482_s13  ;;  %p1490_p12 = scmp.lt.u32.totalorder %s1482_s13, %s1903_s8 }
 0x259   : > { %p1484_p7 = pnand %p1483_p4, %p1603_p5 }
 0x25a   : > { %p1489_p11 = por %p1488_p10, %p1487_p9 }
 0x25b   : > { %p1485_p8 = pneg %p1484_p7 }
 0x25c   : > { %p1491_p13 = por %p1490_p12, %p1489_p11 }
 0x25e   : > { %p1492_p0 = pnand %p1491_p13, %p1485_p8 }
 0x260   : > { %1495 = shalt.err (!%p1492_p0)
}
 0x261   : > { %s1533_s25 = smov 128   ;;  %s1534_s26 = smov 8  }
 0x262   : > { %1411 = dma.vmem_to_hbm [thread:$0]  (%p1603_p5), %s1905_s30, 256, %s1903_s8, %s1908_s22, %s1533_s25, %s1533_s25, %s1534_s26  }
 0x263 PF: > { %p1417_p1 = scmp.ge.s32.totalorder %s1530_s21, 2  ;;  %s901_s6 = sand.u32 1, %s1518_s18  }
 0x264   : > { %s902_s7 = scalar_lea.sflag [#allocation3], %s901_s6 }
 0x265   : > { %p1414_p2 = pnand %p1417_p1, %p1607_p6 }
 0x267   : > { %1513 = dma.done.wait (!%p1414_p2), %s902_s7, 256  }
 0x268   : > { %1515 = vsyncadd (!%p1414_p2), %s902_s7, 4294967040  ;;  %p15_p3 = scmp.ge.s32.totalorder %s1590_s24, 4   ;;  %s1961_s18 = smov %s1522_s19 }
 0x269   : > { %s1962_s19 = smov %s1526_s20  ;;  %s1963_s20 = smov %s1601_s27 }
 0x26a   : > { %s1964_s21 = smov %s1590_s24  ;;  %17 = sbr.rel (!%p15_p3) target bundleno = 3 (0x3), region = 79 }
 0x271   :  { %907 = vsyncpa [#allocation3], 1 }
 0x272   :  { %909 = vsyncpa [#allocation3 + $0x1], 1 }

</bundles_post_ra>
